<compile_context>
chip_gen: v5e
topology: v5e:2x2
jax: 0.10.0
libtpu: 0.0.40
codegen_flags: <defaults>
</compile_context>

<pallas_src>
import functools

import jax
import jax.numpy as jnp
from jax.experimental import pallas as pl
from jax.experimental.pallas import tpu as pltpu


# --------------------------------------------------------------------------
# Pass 1: accumulate per-(batch, group) [sum, sum_sq] over HW tiles; on the
# last tile, fold group stats into per-channel GroupNorm scale/shift.
# --------------------------------------------------------------------------
def _stats_affine_kernel(f_ref, mt_ref, m_ref, gamma_ref, beta_ref,
                         affine_ref, acc_ref, *, inv_count, eps):
    t = pl.program_id(1)

    @pl.when(t == 0)
    def _init():
        acc_ref[...] = jnp.zeros_like(acc_ref)

    f_t = f_ref[0].astype(jnp.float32)                        # (Cf, T)
    csum = jnp.sum(f_t, axis=1, keepdims=True)                # (Cf, 1)
    csq = jnp.sum(f_t * f_t, axis=1, keepdims=True)           # (Cf, 1)
    per_channel = jnp.concatenate([csum, csq], axis=1)        # (Cf, 2)
    # Fold channels into groups with a one-hot matmul (MXU).
    acc_ref[...] += jnp.dot(mt_ref[...], per_channel,
                            preferred_element_type=jnp.float32)   # (G, 2)

    @pl.when(t == pl.num_programs(1) - 1)
    def _finalize():
        sums = acc_ref[...]                                   # (G, 2)
        mean_g = sums[:, 0:1] * inv_count                     # (G, 1)
        ex2_g = sums[:, 1:2] * inv_count
        # E[x^2] - mean^2 can go slightly negative in fp32; clamp before rsqrt.
        var_g = jnp.maximum(ex2_g - mean_g * mean_g, 0.0)
        inv_g = jax.lax.rsqrt(var_g + eps)
        # Un-fold groups back to channels with the transposed one-hot (MXU).
        per_c = jnp.dot(m_ref[...],
                        jnp.concatenate([mean_g, inv_g], axis=1),
                        preferred_element_type=jnp.float32)   # (Cf, 2): [mean_c, inv_c]
        scale = per_c[:, 1:2] * gamma_ref[...]                # (Cf, 1)
        shift = beta_ref[...] - per_c[:, 0:1] * scale         # (Cf, 1)
        affine_ref[0] = jnp.concatenate([scale, shift], axis=1)   # (Cf, 2)


# --------------------------------------------------------------------------
# Pass 2a: apply kernel, zq already at output resolution (no upsampling).
# --------------------------------------------------------------------------
def _apply_simple_kernel(f_ref, zq_ref, aff_ref, w_ref, bias_ref, o_ref, *, cf):
    aff = aff_ref[0]                                          # (Cf, 2)
    scale = aff[:, 0:1]
    shift = aff[:, 1:2]
    zq_t = zq_ref[0].astype(jnp.float32)                      # (Cz, T)
    yb = jnp.dot(w_ref[...], zq_t,
                 preferred_element_type=jnp.float32) + bias_ref[...]   # (2Cf, T)
    f_t = f_ref[0].astype(jnp.float32)                        # (Cf, T)
    o_ref[0] = ((f_t * scale + shift) * yb[:cf, :] + yb[cf:, :]).astype(o_ref.dtype)


# --------------------------------------------------------------------------
# Pass 2b: apply kernel with in-kernel nearest upsample (integer factors).
# --------------------------------------------------------------------------
def _apply_upsample_kernel(f_ref, zq_ref, aff_ref, w_ref, bias_ref, uw_ref, o_ref,
                           *, cf, r_h, r_c, wz, w_hi, t_hlo):
    aff = aff_ref[0]                                          # (Cf, 2)
    scale = aff[:, 0:1]
    shift = aff[:, 1:2]
    # Fused [conv_y; conv_b] 1x1 conv + bias at the LOW resolution (both
    # commute with nearest upsample), so MXU work scales with Hz*Wz not H*W.
    zq_t = zq_ref[0].astype(jnp.float32)                      # (Cz, T_lo)
    yb_lo = jnp.dot(w_ref[...], zq_t,
                    preferred_element_type=jnp.float32) + bias_ref[...]   # (2Cf, T_lo)

    seg = r_h * w_hi                      # flattened width of one source-row group
    for s in range(t_hlo):                # static unroll over low-res rows in tile
        yb_s = yb_lo[:, s * wz:(s + 1) * wz]                  # (2Cf, Wz)
        if r_c > 1:
            # Column-wise nearest upsample = one-hot matmul on the MXU.
            yb_s = jnp.dot(yb_s, uw_ref[...],
                           preferred_element_type=jnp.float32)  # (2Cf, W)
        y_s = yb_s[:cf, :]
        b_s = yb_s[cf:, :]
        if r_h > 1:
            # Row-wise nearest upsample: each output row repeats the full
            # W-wide source row, so it is a lane-concatenation of copies.
            y_s = jnp.concatenate([y_s] * r_h, axis=1)        # (Cf, r_h*W)
            b_s = jnp.concatenate([b_s] * r_h, axis=1)
        lo, hi = s * seg, (s + 1) * seg
        f_seg = f_ref[0, :, lo:hi].astype(jnp.float32)        # (Cf, r_h*W)
        o_ref[0, :, lo:hi] = ((f_seg * scale + shift) * y_s + b_s).astype(o_ref.dtype)


# --------------------------------------------------------------------------
# Tiling helper: rows per tile (divisor of H, multiple of r_h) obeying the
# (8,128) lane constraint for both the f block and the low-res zq block.
# --------------------------------------------------------------------------
def _choose_row_tile(H, W, Hz, Wz, Cf, r_h, upsample,
                     max_block_bytes=4 * 1024 * 1024):
    max_rows = max(1, max_block_bytes // max(1, Cf * W * 4))
    cands = []
    t = r_h
    while t <= H:
        if H % t == 0:
            t_lo = t // r_h
            ok_f = (t * W) % 128 == 0 or t == H
            ok_z = (t_lo * Wz) % 128 == 0 or t_lo == Hz
            ok_unroll = (not upsample) or t_lo <= 16
            if ok_f and ok_z and ok_unroll:
                cands.append(t)
        t += r_h
    if not cands:
        return None
    within = [c for c in cands if c <= max_rows]
    return max(within) if within else min(cands)


# --------------------------------------------------------------------------
# Wrapper.
# --------------------------------------------------------------------------
def spatial_norm(f, zq, gamma, beta, wy, by, wb, bb, *, num_groups=32, eps=1e-6):
    """f: (N, Cf, H, W)   zq: (N, Cz, Hz, Wz)   -> (N, Cf, H, W)  (NCHW)."""
    N, Cf, H, W = f.shape
    Nz, Cz, Hz, Wz = zq.shape
    assert N == Nz
    assert Cf % num_groups == 0, "f_channels must be divisible by num_groups"
    G = num_groups
    cg = Cf // G
    HW = H * W

    # ---- choose upsampling strategy -------------------------------------
    integer_scale = (H % Hz == 0) and (W % Wz == 0)
    upsample_in_kernel = integer_scale and (H, W) != (Hz, Wz)
    r_h, r_c = 1, 1
    T_h = None
    if upsample_in_kernel:
        r_h, r_c = H // Hz, W // Wz
        T_h = _choose_row_tile(H, W, Hz, Wz, Cf, r_h, upsample=True)
        if T_h is None:
            upsample_in_kernel = False
    if not upsample_in_kernel:
        if (H, W) != (Hz, Wz):
            # TODO(synk): non-integer nearest scales fall back to a wrapper-side
            # gather that materializes the upsampled zq (integer scales stay low-res).
            rows = (jnp.arange(H) * Hz) // H
            cols = (jnp.arange(W) * Wz) // W
            zq = zq[:, :, rows[:, None], cols[None, :]]
        Hz, Wz = H, W
        r_h, r_c = 1, 1
        T_h = _choose_row_tile(H, W, Hz, Wz, Cf, 1, upsample=False)

    T = T_h * W
    nT = H // T_h
    T_hlo = T_h // r_h
    T_lo = T_hlo * Wz

    # ---- channels-first, flattened spatial: reshapes only (no relayout) --
    f_l = f.reshape(N, Cf, HW)
    zq_l = zq.reshape(N, Cz, Hz * Wz)

    # ---- small parameters (fp32) -----------------------------------------
    gamma2 = gamma.reshape(Cf, 1).astype(jnp.float32)
    beta2 = beta.reshape(Cf, 1).astype(jnp.float32)
    w_cat = jnp.concatenate([wy.reshape(Cf, Cz), wb.reshape(Cf, Cz)],
                            axis=0).astype(jnp.float32)       # (2Cf, Cz)
    b_cat = jnp.concatenate([by.reshape(Cf, 1), bb.reshape(Cf, 1)],
                            axis=0).astype(jnp.float32)       # (2Cf, 1)
    grp = jnp.arange(Cf) // cg
    M = jax.nn.one_hot(grp, G, dtype=jnp.float32)             # (Cf, G)
    Mt = jnp.transpose(M)                                     # (G, Cf) -- precomputed

    inv_count = 1.0 / float(HW * cg)
    vmem_limit = 48 * 1024 * 1024

    # ---- pass 1: group statistics -> per-channel scale/shift --------------
    stats_kernel = functools.partial(_stats_affine_kernel,
                                     inv_count=inv_count, eps=eps)
    affine = pl.pallas_call(
        stats_kernel,
        out_shape=jax.ShapeDtypeStruct((N, Cf, 2), jnp.float32),
        grid_spec=pltpu.PrefetchScalarGridSpec(
            num_scalar_prefetch=0,
            grid=(N, nT),
            in_specs=[
                pl.BlockSpec((1, Cf, T), lambda n, t: (n, 0, t)),   # f tile
                pl.BlockSpec((G, Cf), lambda n, t: (0, 0)),         # M^T
                pl.BlockSpec((Cf, G), lambda n, t: (0, 0)),         # M
                pl.BlockSpec((Cf, 1), lambda n, t: (0, 0)),         # gamma
                pl.BlockSpec((Cf, 1), lambda n, t: (0, 0)),         # beta
            ],
            out_specs=pl.BlockSpec((1, Cf, 2), lambda n, t: (n, 0, 0)),
            scratch_shapes=[pltpu.VMEM((G, 2), jnp.float32)],
        ),
        compiler_params=pltpu.CompilerParams(
            dimension_semantics=("parallel", "arbitrary"),
            vmem_limit_bytes=vmem_limit),
    )(f_l, Mt, M, gamma2, beta2)

    # ---- pass 2: normalize + conditioned affine ---------------------------
    common_specs = [
        pl.BlockSpec((1, Cf, T), lambda n, t: (n, 0, t)),       # f tile
        pl.BlockSpec((1, Cz, T_lo), lambda n, t: (n, 0, t)),    # zq tile (low-res rows)
        pl.BlockSpec((1, Cf, 2), lambda n, t: (n, 0, 0)),       # per-channel scale/shift
        pl.BlockSpec((2 * Cf, Cz), lambda n, t: (0, 0)),        # [wy; wb]
        pl.BlockSpec((2 * Cf, 1), lambda n, t: (0, 0)),         # [by; bb]
    ]
    common_args = (f_l, zq_l, affine, w_cat, b_cat)

    if upsample_in_kernel:
        cols = (jnp.arange(W) * Wz) // W
        Uw = jnp.transpose(jax.nn.one_hot(cols, Wz, dtype=jnp.float32))   # (Wz, W)
        kernel = functools.partial(
            _apply_upsample_kernel,
            cf=Cf, r_h=r_h, r_c=r_c, wz=Wz, w_hi=W, t_hlo=T_hlo)
        in_specs = common_specs + [pl.BlockSpec((Wz, W), lambda n, t: (0, 0))]
        args = common_args + (Uw,)
    else:
        kernel = functools.partial(_apply_simple_kernel, cf=Cf)
        in_specs = common_specs
        args = common_args

    out_l = pl.pallas_call(
        kernel,
        out_shape=jax.ShapeDtypeStruct((N, Cf, HW), f.dtype),
        grid_spec=pltpu.PrefetchScalarGridSpec(
            num_scalar_prefetch=0,
            grid=(N, nT),
            in_specs=in_specs,
            out_specs=pl.BlockSpec((1, Cf, T), lambda n, t: (n, 0, t)),
        ),
        compiler_params=pltpu.CompilerParams(
            dimension_semantics=("parallel", "parallel"),
            vmem_limit_bytes=vmem_limit),
    )(*args)

    return out_l.reshape(N, Cf, H, W)


# --------------------------------------------------------------------------
# Pure-JAX reference mirroring the PyTorch forward.
# --------------------------------------------------------------------------
def _reference(f, zq, gamma, beta, wy, by, wb, bb, *, num_groups=32, eps=1e-6):
    N, Cf, H, W = f.shape
    _, Cz, Hz, Wz = zq.shape
    rows = (jnp.arange(H) * Hz) // H
    cols = (jnp.arange(W) * Wz) // W
    zq_up = zq[:, :, rows[:, None], cols[None, :]]
    fg = f.reshape(N, num_groups, Cf // num_groups, H, W)
    mean = jnp.mean(fg, axis=(2, 3, 4), keepdims=True)
    var = jnp.var(fg, axis=(2, 3, 4), keepdims=True)
    norm_f = ((fg - mean) / jnp.sqrt(var + eps)).reshape(N, Cf, H, W)
    norm_f = norm_f * gamma[None, :, None, None] + beta[None, :, None, None]
    y = jnp.einsum("nchw,oc->nohw", zq_up, wy.reshape(Cf, Cz)) + by[None, :, None, None]
    b = jnp.einsum("nchw,oc->nohw", zq_up, wb.reshape(Cf, Cz)) + bb[None, :, None, None]
    return norm_f * y + b


if __name__ == "__main__":
    key = jax.random.PRNGKey(0)
    k_f, k_zq, k_wy, k_by, k_wb, k_bb = jax.random.split(key, 6)

    N, Cf, Cz = 2, 64, 32          # f_channels=64 (divisible by 32 groups), zq_channels=32
    H, W = 16, 16
    Hz, Wz = 8, 8                  # 2x nearest upsample in both dims

    f = jax.random.normal(k_f, (N, Cf, H, W), dtype=jnp.float32)
    zq = jax.random.normal(k_zq, (N, Cz, Hz, Wz), dtype=jnp.float32)

    gamma = jnp.ones((Cf,), jnp.float32)
    beta = jnp.zeros((Cf,), jnp.float32)
    wy = 0.1 * jax.random.normal(k_wy, (Cf, Cz, 1, 1), dtype=jnp.float32)
    by = 0.1 * jax.random.normal(k_by, (Cf,), dtype=jnp.float32)
    wb = 0.1 * jax.random.normal(k_wb, (Cf, Cz, 1, 1), dtype=jnp.float32)
    bb = 0.1 * jax.random.normal(k_bb, (Cf,), dtype=jnp.float32)

    out = spatial_norm(f, zq, gamma, beta, wy, by, wb, bb)
    out = jax.block_until_ready(out)

    ref = _reference(f, zq, gamma, beta, wy, by, wb, bb)
    assert out.shape == (N, Cf, H, W)
    assert jnp.max(jnp.abs(out - ref)) < 1e-3, "mismatch vs reference"

    print("KERNEL_OK")
</pallas_src>

<mosaic_0001>
module attributes {stable_mosaic.version = 11 : i64} {
  func.func @_stats_affine_kernel(%arg0: i32, %arg1: i32, %arg2: memref<1x64x256xf32, #tpu.memory_space<vmem>>, %arg3: memref<32x64xf32, #tpu.memory_space<vmem>>, %arg4: memref<64x32xf32, #tpu.memory_space<vmem>>, %arg5: memref<64x1xf32, #tpu.memory_space<vmem>>, %arg6: memref<64x1xf32, #tpu.memory_space<vmem>>, %arg7: memref<1x64x2xf32, #tpu.memory_space<vmem>>, %arg8: memref<32x2xf32, #tpu.memory_space<vmem>>) attributes {dimension_semantics = [#tpu.dimension_semantics<parallel>, #tpu.dimension_semantics<arbitrary>], iteration_bounds = array<i64: 2, 1>, scalar_prefetch = 0 : i64, scratch_operands = 1 : i64, tpu.core_type = #tpu.core_type<tc>, window_params = [{transform_indices = @transform_0, window_bounds = array<i64: 1, 64, 256>}, {pipeline_mode = #tpu.pipeline_mode<synchronous>, transform_indices = @transform_1, window_bounds = array<i64: 32, 64>}, {pipeline_mode = #tpu.pipeline_mode<synchronous>, transform_indices = @transform_2, window_bounds = array<i64: 64, 32>}, {pipeline_mode = #tpu.pipeline_mode<synchronous>, transform_indices = @transform_3, window_bounds = array<i64: 64, 1>}, {pipeline_mode = #tpu.pipeline_mode<synchronous>, transform_indices = @transform_4, window_bounds = array<i64: 64, 1>}, {transform_indices = @transform_5, window_bounds = array<i64: 1, 64, 2>}]} {
    %c0_i32 = arith.constant 0 : i32
    %0 = arith.cmpi eq, %arg1, %c0_i32 : i32
    %1 = arith.extui %0 : i1 to i32
    %c0_i32_0 = arith.constant 0 : i32
    %2 = arith.cmpi ne, %1, %c0_i32_0 : i32
    scf.if %2 {
      %cst_13 = arith.constant 0.000000e+00 : f32
      %19 = vector.broadcast %cst_13 : f32 to vector<32x2xf32>
      %c0_14 = arith.constant 0 : index
      %c0_15 = arith.constant 0 : index
      %20 = vector.load %arg8[%c0_14, %c0_15] : memref<32x2xf32, #tpu.memory_space<vmem>>, vector<32x2xf32>
      tpu.vector_store %arg8[%c0_14, %c0_15], %19 {strides = array<i32>} : memref<32x2xf32, #tpu.memory_space<vmem>>, vector<32x2xf32>,
    } else {
    }
    %c0 = arith.constant 0 : index
    %c0_1 = arith.constant 0 : index
    %c0_2 = arith.constant 0 : index
    %3 = vector.load %arg2[%c0, %c0_1, %c0_2] : memref<1x64x256xf32, #tpu.memory_space<vmem>>, vector<1x64x256xf32>
    %4 = vector.shape_cast %3 : vector<1x64x256xf32> to vector<64x256xf32>
    %cst = arith.constant dense<0.000000e+00> : vector<64xf32>
    %5 = vector.multi_reduction <add>, %4, %cst [1] : vector<64x256xf32> to vector<64xf32>
    %6 = vector.shape_cast %5 : vector<64xf32> to vector<64x1xf32>
    %7 = arith.mulf %4, %4 : vector<64x256xf32>
    %cst_3 = arith.constant dense<0.000000e+00> : vector<64xf32>
    %8 = vector.multi_reduction <add>, %7, %cst_3 [1] : vector<64x256xf32> to vector<64xf32>
    %9 = vector.shape_cast %8 : vector<64xf32> to vector<64x1xf32>
    %10 = tpu.concatenate %6, %9 in 1 : vector<64x1xf32>, vector<64x1xf32> -> vector<64x2xf32>
    %c0_4 = arith.constant 0 : index
    %c0_5 = arith.constant 0 : index
    %11 = vector.load %arg8[%c0_4, %c0_5] : memref<32x2xf32, #tpu.memory_space<vmem>>, vector<32x2xf32>
    %c0_6 = arith.constant 0 : index
    %c0_7 = arith.constant 0 : index
    %12 = vector.load %arg3[%c0_6, %c0_7] : memref<32x64xf32, #tpu.memory_space<vmem>>, vector<32x64xf32>
    %cst_8 = arith.constant dense<0.000000e+00> : vector<32x2xf32>
    %13 = tpu.matmul %12, %10, %cst_8 {dimension_numbers = #tpu.dot_dimension_numbers<[1], [0], [0], [1], [0, 0, 1, 1], [], []>} : vector<32x64xf32>, vector<64x2xf32>, vector<32x2xf32> -> vector<32x2xf32>
    %14 = arith.addf %11, %13 : vector<32x2xf32>
    %c0_9 = arith.constant 0 : index
    %c0_10 = arith.constant 0 : index
    %15 = vector.load %arg8[%c0_9, %c0_10] : memref<32x2xf32, #tpu.memory_space<vmem>>, vector<32x2xf32>
    tpu.vector_store %arg8[%c0_9, %c0_10], %14 {strides = array<i32>} : memref<32x2xf32, #tpu.memory_space<vmem>>, vector<32x2xf32>,
    %c0_i32_11 = arith.constant 0 : i32
    %16 = arith.cmpi eq, %arg1, %c0_i32_11 : i32
    %17 = arith.extui %16 : i1 to i32
    %c0_i32_12 = arith.constant 0 : i32
    %18 = arith.cmpi ne, %17, %c0_i32_12 : i32
    scf.if %18 {
      %c0_13 = arith.constant 0 : index
      %c0_14 = arith.constant 0 : index
      %19 = vector.load %arg8[%c0_13, %c0_14] : memref<32x2xf32, #tpu.memory_space<vmem>>, vector<32x2xf32>
      %20 = vector.extract_strided_slice %19 {offsets = [0, 0], sizes = [32, 1], strides = [1, 1]} : vector<32x2xf32> to vector<32x1xf32>
      %cst_15 = arith.constant 0.001953125 : f32
      %21 = vector.broadcast %cst_15 : f32 to vector<32x1xf32>
      %22 = arith.mulf %20, %21 : vector<32x1xf32>
      %23 = vector.extract_strided_slice %19 {offsets = [0, 1], sizes = [32, 1], strides = [1, 1]} : vector<32x2xf32> to vector<32x1xf32>
      %cst_16 = arith.constant 0.001953125 : f32
      %24 = vector.broadcast %cst_16 : f32 to vector<32x1xf32>
      %25 = arith.mulf %23, %24 : vector<32x1xf32>
      %26 = arith.mulf %22, %22 : vector<32x1xf32>
      %27 = arith.subf %25, %26 : vector<32x1xf32>
      %cst_17 = arith.constant 0.000000e+00 : f32
      %28 = vector.broadcast %cst_17 : f32 to vector<32x1xf32>
      %29 = arith.maximumf %27, %28 : vector<32x1xf32>
      %cst_18 = arith.constant 9.99999997E-7 : f32
      %30 = vector.broadcast %cst_18 : f32 to vector<32x1xf32>
      %31 = arith.addf %29, %30 : vector<32x1xf32>
      %32 = math.rsqrt %31 : vector<32x1xf32>
      %c0_19 = arith.constant 0 : index
      %c0_20 = arith.constant 0 : index
      %33 = vector.load %arg4[%c0_19, %c0_20] : memref<64x32xf32, #tpu.memory_space<vmem>>, vector<64x32xf32>
      %34 = tpu.concatenate %22, %32 in 1 : vector<32x1xf32>, vector<32x1xf32> -> vector<32x2xf32>
      %cst_21 = arith.constant dense<0.000000e+00> : vector<64x2xf32>
      %35 = tpu.matmul %33, %34, %cst_21 {dimension_numbers = #tpu.dot_dimension_numbers<[1], [0], [0], [1], [0, 0, 1, 1], [], []>} : vector<64x32xf32>, vector<32x2xf32>, vector<64x2xf32> -> vector<64x2xf32>
      %36 = vector.extract_strided_slice %35 {offsets = [0, 1], sizes = [64, 1], strides = [1, 1]} : vector<64x2xf32> to vector<64x1xf32>
      %c0_22 = arith.constant 0 : index
      %c0_23 = arith.constant 0 : index
      %37 = vector.load %arg5[%c0_22, %c0_23] : memref<64x1xf32, #tpu.memory_space<vmem>>, vector<64x1xf32>
      %38 = arith.mulf %36, %37 : vector<64x1xf32>
      %c0_24 = arith.constant 0 : index
      %c0_25 = arith.constant 0 : index
      %39 = vector.load %arg6[%c0_24, %c0_25] : memref<64x1xf32, #tpu.memory_space<vmem>>, vector<64x1xf32>
      %40 = vector.extract_strided_slice %35 {offsets = [0, 0], sizes = [64, 1], strides = [1, 1]} : vector<64x2xf32> to vector<64x1xf32>
      %41 = arith.mulf %40, %38 : vector<64x1xf32>
      %42 = arith.subf %39, %41 : vector<64x1xf32>
      %43 = tpu.concatenate %38, %42 in 1 : vector<64x1xf32>, vector<64x1xf32> -> vector<64x2xf32>
      %c0_26 = arith.constant 0 : index
      %c0_27 = arith.constant 0 : index
      %c0_28 = arith.constant 0 : index
      %44 = vector.load %arg7[%c0_26, %c0_27, %c0_28] : memref<1x64x2xf32, #tpu.memory_space<vmem>>, vector<1x64x2xf32>
      %45 = vector.shape_cast %44 : vector<1x64x2xf32> to vector<64x2xf32>
      %46 = vector.shape_cast %43 : vector<64x2xf32> to vector<1x64x2xf32>
      tpu.vector_store %arg7[%c0_26, %c0_27, %c0_28], %46 {strides = array<i32>} : memref<1x64x2xf32, #tpu.memory_space<vmem>>, vector<1x64x2xf32>,
    } else {
    }
    return
  }
  func.func @transform_0(%arg0: i32, %arg1: i32) -> (i32, i32, i32) {
    %c0_i32 = arith.constant 0 : i32
    %c0_i32_0 = arith.constant 0 : i32
    return %arg0, %c0_i32, %arg1 : i32, i32, i32
  }
  func.func @transform_1(%arg0: i32, %arg1: i32) -> (i32, i32) {
    %c0_i32 = arith.constant 0 : i32
    %c0_i32_0 = arith.constant 0 : i32
    %c0_i32_1 = arith.constant 0 : i32
    return %c0_i32, %c0_i32_0 : i32, i32
  }
  func.func @transform_2(%arg0: i32, %arg1: i32) -> (i32, i32) {
    %c0_i32 = arith.constant 0 : i32
    %c0_i32_0 = arith.constant 0 : i32
    %c0_i32_1 = arith.constant 0 : i32
    return %c0_i32, %c0_i32_0 : i32, i32
  }
  func.func @transform_3(%arg0: i32, %arg1: i32) -> (i32, i32) {
    %c0_i32 = arith.constant 0 : i32
    %c0_i32_0 = arith.constant 0 : i32
    %c0_i32_1 = arith.constant 0 : i32
    return %c0_i32, %c0_i32_0 : i32, i32
  }
  func.func @transform_4(%arg0: i32, %arg1: i32) -> (i32, i32) {
    %c0_i32 = arith.constant 0 : i32
    %c0_i32_0 = arith.constant 0 : i32
    %c0_i32_1 = arith.constant 0 : i32
    return %c0_i32, %c0_i32_0 : i32, i32
  }
  func.func @transform_5(%arg0: i32, %arg1: i32) -> (i32, i32, i32) {
    %c0_i32 = arith.constant 0 : i32
    %c0_i32_0 = arith.constant 0 : i32
    %c0_i32_1 = arith.constant 0 : i32
    return %arg0, %c0_i32, %c0_i32_0 : i32, i32, i32
  }
}

</mosaic_0001>

<bundles_post_ra>
// kernel: tpu_custom_call.1
= control target key start
LH: loop header
LB: loop body
LE: loop exit
PB: predicated region body
PF: predicated region fallthrough
CT: control target
= control target key end

     0   :  { %10 = vsyncpa [#allocation4], 0  ;;  %s1339_s0 = inlined_call_operand.hbm [shape: f32[2,64,256], index: 0, kind: input, shape index: {}]   ;;  %s1340_s1 = inlined_call_operand.vmem [shape: f32[32,64], index: 1, kind: input, shape index: {}]   ;;  %s1341_s2 = inlined_call_operand.vmem [shape: f32[64,32], index: 2, kind: input, shape index: {}]   ;;  %s1342_s3 = inlined_call_operand.vmem [shape: f32[64,1], index: 3, kind: input, shape index: {}]   ;;  %s1343_s4 = inlined_call_operand.vmem [shape: f32[64,1], index: 4, kind: input, shape index: {}]   ;;  %s1344_s5 = inlined_call_operand.vmem [shape: f32[2,64,2], index: 5, kind: output, shape index: {}]  }
   0x1   :  { %12 = vsyncpa [#allocation4 + $0x1], 0  ;;  %s1040_s18 = smov 0   ;;  %s1042_s19 = smov 0  }
   0x2   :  { %s1044_s20 = smov 0   ;;  %s1046_s21 = smov 0  }
   0x3   :  { %s1048_s22 = smov 0   ;;  %s1050_s23 = smov 0  }
   0x4 LB: > { %s812_s24 = sadd.s32 4294967295, %s1003_s23   ;;  %s30_s25 = sadd.s32 1, %s999_s22  ;;  %s1003_s23 = sphi %s1050_s23, %s18_s23   ;;  %s999_s22 = sphi %s1048_s22, %s1355_s22   ;;  %s995_s21 = sphi %s1046_s21, %s1354_s21   ;;  %s991_s20 = sphi %s1044_s20, %s1353_s20   ;;  %s987_s19 = sphi %s1042_s19, %s1352_s19   ;;  %s983_s18 = sphi %s1040_s18, %s1351_s18  }
   0x5   : > { %p32_p0 = scmp.ge.s32.totalorder %s30_s25, 2  ;;  %s39_s26 = sadd.s32 1, %s991_s20 }
   0x6   : > { %p46_p1 = scmp.ne.s32.totalorder %s991_s20, %s987_s19  ;;  %p47_p2 = scmp.eq.s32.totalorder %s1003_s23, 0 }
   0x7   : > { %s1357_s25 = smov (%p32_p0, %s30_s25), 0  ;;  %p52_p4 = scmp.ne.s32.totalorder %s987_s19, %s983_s18 }
   0x8   : > { %p1076_p3 = por %p47_p2, %p46_p1  ;;  %s34_s28 = ssub.s32 %s999_s22, %s1357_s25 }
   0x9   : > { %p53_p5 = scmp.eq.s32.totalorder %s812_s24, 0  ;;  %p37_p6 = scmp.eq.s32.totalorder %s34_s28, 0 }
   0xa   : > { %p861_p8 = scmp.lt.s32.totalorder %s1003_s23, 2  ;;  %s198_s6 = sand.u32 1, %s991_s20  }
   0xb   : > { %p1083_p7 = por %p53_p5, %p52_p4  ;;  %s837_s7 = sshll.u32 %s999_s22, 7 }
   0xc   : > { %s1089_s30 = scalar_select %p37_p6, %s991_s20, %s39_s26  }
   0xd   : > { %s816_s8 = sshll.u32 %s198_s6, 7  ;;  %s209_s11 = scalar_lea.hbm %s1339_s0, %s837_s7 }
   0xe   : > { %s210_s12 = sshll.u32 %s209_s11, 4  ;;  %s202_s13 = scalar_lea.vmem [#allocation3], %s816_s8  ;;  %s211_s12 = int_to_ptr.hbm [resolvable:$true] %s210_s12 }
   0xf   : > { %s212_s14 = sshll.u32 %s202_s13, 4  ;;  %p858_p9 = pnand %p861_p8, %p1076_p3  ;;  %s213_s14 = int_to_ptr.vmem [resolvable:$true] %s212_s14 }
  0x10   : > { %p819_p10 = scmp.ge.s32.totalorder %s1003_s23, 1  ;;  %p220_p11 = scmp.lt.s32.totalorder %s1003_s23, 3 }
  0x11   : > { %s199_s15 = scalar_lea.sflag [#allocation4], %s198_s6  ;;  %s1005_s16 = smov 256  }
  0x12   : > { %s1006_s17 = smov 16   ;;  %p221_p12 = pnand %p819_p10, %p220_p11 }
  0x13   : > { %860 = dma.hbm_to_vmem [thread:$0]  (!%p858_p9), %s211_s12, 2048, %s213_s14, %s199_s15, %s1005_s16, %s1005_s16, %s1006_s17  }
  0x14   : > { %224 = sbr.rel (%p221_p12) target bundleno = 877 (0x36d), region = 40  ;;  %s226_s18 = sand.u32 (!%p221_p12), 1, %s987_s19  }
  0x15   : > { %s820_s24 = sshll.u32 (!%p221_p12), %s226_s18, 7  ;;  %s227_s26 = scalar_lea.sflag (!%p221_p12), [#allocation4], %s226_s18 }
  0x16   : > { %s1101_s28 = scalar_lea.vmem (!%p221_p12), [#allocation3], %s820_s24 }
  0x19   : > { %978 = dma.done.wait (%p1083_p7), %s227_s26, 2048  }
  0x1a   : > { %980 = vsyncadd (%p1083_p7), %s227_s26, 4294965248  ;;  %v287_v0 = vld [vmem:[%s1101_s28 + $0x70] sm:$0xff]  ;;  %v288_v1 = vld [vmem:[%s1101_s28 + $0x78] sm:$0xff]  ;;  %vm353_vm0 = vcmask 7168   ;;  %vm268_vm1 = vcmask 15360   ;;  %vm370_vm2 = vcmask 523264  }
  0x1b   : > { %v285_v2 = vld [vmem:[%s1101_s28 + $0x60] sm:$0xff]  ;;  %v310_v3 = vadd.f32 %v288_v1, %v287_v0  ;;  %v286_v4 = vld [vmem:[%s1101_s28 + $0x68] sm:$0xff]  ;;  %v283_v5 = vld [vmem:[%s1101_s28 + $0x50] sm:$0xff]  ;;  %v327_v9 = vmul.f32 %v287_v0, %v287_v0  ;;  %v328_v10 = vmul.f32 %v288_v1, %v288_v1  ;;  %s1008_s12 = smov 1   ;;  %vm516_vm15 = vcmask 261120   ;;  %s1009_s10 = smov 127  }
  0x1c   : > { %v284_v6 = vld [vmem:[%s1101_s28 + $0x58] sm:$0xff]  ;;  %v307_v7 = vadd.f32 %v286_v4, %v285_v2  ;;  %v325_v11 = vmul.f32 %v285_v2, %v285_v2  ;;  %v326_v12 = vmul.f32 %v286_v4, %v286_v4  ;;  %v323_v13 = vmul.f32 %v283_v5, %v283_v5  ;;  %v281_v18 = vld [vmem:[%s1101_s28 + $0x40] sm:$0xff]  ;;  %v282_v19 = vld [vmem:[%s1101_s28 + $0x48] sm:$0xff]  ;;  %p259_p13 = scmp.lt.s32.totalorder %s995_s21, 1 }
  0x1d   : > { %v304_v8 = vadd.f32 %v284_v6, %v283_v5  ;;  %311 = vadd.xlane.f32.xlu0 %v310_v3  ;;  %v324_v14 = vmul.f32 %v284_v6, %v284_v6  ;;  %v350_v15 = vadd.f32 %v328_v10, %v327_v9  ;;  %v321_v20 = vmul.f32 %v281_v18, %v281_v18  ;;  %v279_v22 = vld [vmem:[%s1101_s28 + $0x30] sm:$0xff]  ;;  %v280_v23 = vld [vmem:[%s1101_s28 + $0x38] sm:$0xff]  ;;  %v277_v29 = vld [vmem:[%s1101_s28 + $0x20] sm:$0xff] }
  0x1e   : > { %308 = vadd.xlane.f32.xlu1 %v307_v7  ;;  %v347_v16 = vadd.f32 %v326_v12, %v325_v11  ;;  %v322_v21 = vmul.f32 %v282_v19, %v282_v19  ;;  %v301_v24 = vadd.f32 %v282_v19, %v281_v18  ;;  %v298_v26 = vadd.f32 %v280_v23, %v279_v22  ;;  %v278_v30 = vld [vmem:[%s1101_s28 + $0x28] sm:$0xff]  ;;  %v275_v36 = vld [vmem:[%s1101_s28 + $0x10] sm:$0xff]  ;;  %v276_v37 = vld [vmem:[%s1101_s28 + $0x18] sm:$0xff]  ;;  %s1359_s21 = smov (!%p259_p13, %s995_s21), 1 }
  0x1f   : > { %305 = vadd.xlane.f32.xlu2 %v304_v8  ;;  %v344_v17 = vadd.f32 %v324_v14, %v323_v13  ;;  %v319_v27 = vmul.f32 %v279_v22, %v279_v22  ;;  %v320_v28 = vmul.f32 %v280_v23, %v280_v23  ;;  %v317_v31 = vmul.f32 %v277_v29, %v277_v29  ;;  %v273_v41 = vld [vmem:[%s1101_s28] sm:$0xff]  ;;  %v274_v42 = vld [vmem:[%s1101_s28 + $0x8] sm:$0xff]  ;;  %v368_v11 = vld [vmem:[%s1340_s1 + $0x10] sm:$0xff] }
  0x20   : > { %v341_v25 = vadd.f32 %v322_v21, %v321_v20  ;;  %v318_v32 = vmul.f32 %v278_v30, %v278_v30  ;;  %v295_v34 = vadd.f32 %v278_v30, %v277_v29  ;;  %v315_v38 = vmul.f32 %v275_v36, %v275_v36  ;;  %v367_v8 = vld [vmem:[%s1340_s1 + $0x8] sm:$0xff]  ;;  %v366_v9 = vld [vmem:[%s1340_s1] sm:$0xff]  ;;  %v369_v12 = vld [vmem:[%s1340_s1 + $0x18] sm:$0xff] }
  0x21   : > { %v338_v33 = vadd.f32 %v320_v28, %v319_v27  ;;  %v316_v39 = vmul.f32 %v276_v37, %v276_v37  ;;  %v292_v40 = vadd.f32 %v276_v37, %v275_v36  ;;  %v289_v44 = vadd.f32 %v274_v42, %v273_v41 }
  0x22   : > { %v335_v35 = vadd.f32 %v318_v32, %v317_v31  ;;  %v313_v45 = vmul.f32 %v273_v41, %v273_v41  ;;  %v314_v46 = vmul.f32 %v274_v42, %v274_v42  ;;  %v1007_v2 = vmov 0.0  }
  0x23   : > { %v332_v43 = vadd.f32 %v316_v39, %v315_v38  ;;  %270 = vst.msk [vmem:[#allocation2 + $0x8] sm:$0xff] %vm268_vm1, %v1007_v2 }
  0x24   : > { %v329_v47 = vadd.f32 %v314_v46, %v313_v45  ;;  %269 = vst.msk [vmem:[#allocation2] sm:$0xff] %vm268_vm1, %v1007_v2 }
  0x25   : > { %351 = vadd.xlane.f32.xlu0 %v350_v15  ;;  %271 = vst.msk [vmem:[#allocation2 + $0x10] sm:$0xff] %vm268_vm1, %v1007_v2 }
  0x26   : > { %348 = vadd.xlane.f32.xlu1 %v347_v16  ;;  %272 = vst.msk [vmem:[#allocation2 + $0x18] sm:$0xff] %vm268_vm1, %v1007_v2 }
  0x27   : > { %345 = vadd.xlane.f32.xlu2 %v344_v17 }
  0x2a   : > { %v363_v16 = vld [vmem:[#allocation2 + $0x8] sm:$0xff] }
  0x2b   : > { %v362_v13 = vld [vmem:[#allocation2] sm:$0xff] }
  0x2c   : > { %v364_v19 = vld [vmem:[#allocation2 + $0x10] sm:$0xff] }
  0x2d   : > { %302 = vadd.xlane.f32.xlu0 %v301_v24 }
  0x2e   : > { %342 = vadd.xlane.f32.xlu1 %v341_v25  ;;  %v365_v25 = vld [vmem:[#allocation2 + $0x18] sm:$0xff] }
  0x2f   : > { %299 = vadd.xlane.f32.xlu2 %v298_v26 }
  0x35   : > { %339 = vadd.xlane.f32.xlu0 %v338_v33 }
  0x36   : > { %296 = vadd.xlane.f32.xlu1 %v295_v34 }
  0x37   : > { %336 = vadd.xlane.f32.xlu2 %v335_v35 }
  0x3d   : > { %293 = vadd.xlane.f32.xlu0 %v292_v40 }
  0x3e   : > { %333 = vadd.xlane.f32.xlu1 %v332_v43 }
  0x3f   : > { %290 = vadd.xlane.f32.xlu2 %v289_v44 }
  0x45   : > { %330 = vadd.xlane.f32.xlu0 %v329_v47 }
  0x90   : > { %v312_v48 = vpop.xlane.xlu0 %311 }
  0x91   : > { %v309_v49 = vpop.xlane.xlu1 %308 }
  0x92   : > { %v306_v50 = vpop.xlane.xlu2 %305 }
  0x98   : > { %v352_v51 = vpop.xlane.xlu0 %351 }
  0x99   : > { %v349_v52 = vpop.xlane.xlu1 %348  ;;  %v361_v54 = vsel %vm353_vm0, %v312_v48, %v352_v51 }
  0x9a   : > { %v346_v53 = vpop.xlane.xlu2 %345  ;;  %391 = vmatpush.msra.mxu0 %v361_v54  ;;  %839 = vmatpush.msra.mxu3 %v361_v54  ;;  %v360_v55 = vsel %vm353_vm0, %v309_v49, %v349_v52 }
  0x9b   : > { %v359_v56 = vsel %vm353_vm0, %v306_v50, %v346_v53 }
  0x9c   : > { %392 = vmatpush.msra.mxu0 %v360_v55  ;;  %840 = vmatpush.msra.mxu3 %v360_v55 }
  0x9e   : > { %393 = vmatpush.msra.mxu0 %v359_v56  ;;  %841 = vmatpush.msra.mxu3 %v359_v56 }
  0xa0   : > { %v303_v57 = vpop.xlane.xlu0 %302 }
  0xa1   : > { %v343_v58 = vpop.xlane.xlu1 %342 }
  0xa2   : > { %v300_v59 = vpop.xlane.xlu2 %299  ;;  %v358_v60 = vsel %vm353_vm0, %v303_v57, %v343_v58 }
  0xa3   : > { %394 = vmatpush.msra.mxu0 %v358_v60  ;;  %842 = vmatpush.msra.mxu3 %v358_v60 }
  0xa8   : > { %v340_v61 = vpop.xlane.xlu0 %339 }
  0xa9   : > { %v297_v62 = vpop.xlane.xlu1 %296  ;;  %v357_v63 = vsel %vm353_vm0, %v300_v59, %v340_v61  ;;  %v582_v61 = vld [vmem:[%s1342_s3] sm:$0xff] }
  0xaa   : > { %v337_v0 = vpop.xlane.xlu2 %336  ;;  %395 = vmatpush.msra.mxu0 %v357_v63  ;;  %843 = vmatpush.msra.mxu3 %v357_v63 }
  0xab   : > { %v356_v1 = vsel %vm353_vm0, %v297_v62, %v337_v0  ;;  %v583_v62 = vld [vmem:[%s1342_s3 + $0x8] sm:$0xff] }
  0xac   : > { %396 = vmatpush.msra.mxu0 %v356_v1  ;;  %844 = vmatpush.msra.mxu3 %v356_v1 }
  0xb0   : > { %v294_v3 = vpop.xlane.xlu0 %293 }
  0xb1   : > { %v334_v4 = vpop.xlane.xlu1 %333 }
  0xb2   : > { %v355_v5 = vsel %vm353_vm0, %v294_v3, %v334_v4  ;;  %v291_v6 = vpop.xlane.xlu2 %290 }
  0xb3   : > { %397 = vmatpush.msra.mxu0 %v355_v5  ;;  %845 = vmatpush.msra.mxu3 %v355_v5 }
  0xb8   : > { %v331_v7 = vpop.xlane.xlu0 %330 }
  0xb9   : > { %v354_v10 = vsel %vm353_vm0, %v291_v6, %v331_v7 }
  0xba   : > { %398 = vmatpush.msra.mxu0 %v354_v10  ;;  %846 = vmatpush.msra.mxu3 %v354_v10 }
  0xbb   : > { %824 = vmatmul.msk.f32.vlgmr.msra.gmra.mxu3 %vm370_vm2, %v367_v8  ;;  %823 = vmatmul.msk.f32.vlgmr.msra.gmra.mxu0 %vm370_vm2, %v366_v9  ;;  %v586_v9 = vld [vmem:[%s1342_s3 + $0x20] sm:$0xff] }
  0xc3   : > { %825 = vmatmul.msk.f32.gmra.mxu3 %vm370_vm2, %v368_v11 }
  0xcb   : > { %826 = vmatmul.msk.f32.gmra.mxu3 %vm370_vm2, %v369_v12 }
 0x138   : > { %v400_v14 = vpop.f32.mrf.mxu0 }
 0x139   : > { %v412_v15 = vadd.f32 %v400_v14, %v362_v13 }
 0x13b   : > { %417 = vst.msk [vmem:[#allocation2] sm:$0xff] %vm268_vm1, %v412_v15 }
 0x13e   : > { %v403_v17 = vpop.f32.mrf.mxu3 }
 0x13f   : > { %v413_v18 = vadd.f32 %v403_v17, %v363_v16 }
 0x141   : > { %418 = vst.msk [vmem:[#allocation2 + $0x8] sm:$0xff] %vm268_vm1, %v413_v18 }
 0x142   : > { %v424_v30 = vld [vmem:[#allocation2] sm:$0xff] }
 0x143   : > { %v1161_v32 = vmul.f32 0.001953125, %v424_v30 }
 0x145   : > { %v432_v35 = vmul.f32 %v1161_v32, %v1161_v32 }
 0x146   : > { %v406_v20 = vpop.f32.mrf.mxu3 }
 0x147   : > { %v414_v21 = vadd.f32 %v406_v20, %v364_v19 }
 0x148   : > { %v425_v22 = vld [vmem:[#allocation2 + $0x8] sm:$0xff] }
 0x149   : > { %419 = vst.msk [vmem:[#allocation2 + $0x10] sm:$0xff] %vm268_vm1, %v414_v21  ;;  %v1150_v23 = vmul.f32 0.001953125, %v425_v22  ;;  %v585_v22 = vld [vmem:[%s1342_s3 + $0x18] sm:$0xff] }
 0x14b   : > { %v433_v24 = vmul.f32 %v1150_v23, %v1150_v23 }
 0x14d   : > { %442 = vrot.lane.b32.xlu0 %v433_v24, %s1008_s12  ;;  %v589_v24 = vld [vmem:[%s1342_s3 + $0x38] sm:$0xff] }
 0x14e   : > { %v409_v26 = vpop.f32.mrf.mxu3 }
 0x14f   : > { %v415_v27 = vadd.f32 %v409_v26, %v365_v25 }
 0x150   : > { %v426_v28 = vld [vmem:[#allocation2 + $0x10] sm:$0xff] }
 0x151   : > { %420 = vst.msk [vmem:[#allocation2 + $0x18] sm:$0xff] %vm268_vm1, %v415_v27  ;;  %v1156_v29 = vmul.f32 0.001953125, %v426_v28  ;;  %v584_v27 = vld [vmem:[%s1342_s3 + $0x10] sm:$0xff] }
 0x153   : > { %v434_v31 = vmul.f32 %v1156_v29, %v1156_v29 }
 0x155   : > { %444 = vrot.lane.b32.xlu2 %v434_v31, %s1008_s12  ;;  %600 = vrot.lane.b32.xlu0 %v583_v62, %s1008_s12  ;;  %v505_v31 = vld [vmem:[%s1341_s2 + $0x8] sm:$0xff] }
 0x158   : > { %v427_v33 = vld [vmem:[#allocation2 + $0x18] sm:$0xff] }
 0x159   : > { %v1163_v34 = vmul.f32 0.001953125, %v427_v33  ;;  %v588_v33 = vld [vmem:[%s1342_s3 + $0x30] sm:$0xff] }
 0x15b   : > { %v435_v36 = vmul.f32 %v1163_v34, %v1163_v34 }
 0x15d   : > { %446 = vrot.lane.b32.xlu1 %v435_v36, %s1008_s12  ;;  %440 = vrot.lane.b32.xlu2 %v432_v35, %s1008_s12  ;;  %v509_v35 = vld [vmem:[%s1341_s2 + $0x28] sm:$0xff]  ;;  %v507_v36 = vld [vmem:[%s1341_s2 + $0x18] sm:$0xff] }
 0x15e   : > { %606 = vrot.lane.b32.xlu0 %v586_v9, %s1008_s12  ;;  %v636_v9 = vld [vmem:[%s1343_s4 + $0x30] sm:$0xff] }
 0x165   : > { %598 = vrot.lane.b32.xlu1 %v582_v61, %s1008_s12  ;;  %602 = vrot.lane.b32.xlu2 %v584_v27, %s1008_s12 }
 0x166   : > { %612 = vrot.lane.b32.xlu0 %v589_v24, %s1008_s12  ;;  %v635_v24 = vld [vmem:[%s1343_s4 + $0x28] sm:$0xff] }
 0x16d   : > { %604 = vrot.lane.b32.xlu1 %v585_v22, %s1008_s12 }
 0x175   : > { %610 = vrot.lane.b32.xlu1 %v588_v33, %s1008_s12 }
 0x1af   : > { %v445_v37 = vpop.permute.xlu2 %444 }
 0x1b0   : > { %v454_v38 = vsub.f32 %v1156_v29, %v445_v37  ;;  %v510_v37 = vld [vmem:[%s1341_s2 + $0x30] sm:$0xff] }
 0x1b2   : > { %v458_v42 = vmax.f32 %v454_v38, 0.0  ;;  %v511_v38 = vld [vmem:[%s1341_s2 + $0x38] sm:$0xff] }
 0x1b4   : > { %v462_v45 = vadd.f32 1e-06, %v458_v42 }
 0x1b6   : > { %915 = vrsqrt.f32 %v462_v45  ;;  %vm490_vm5 = vweird.f32 %v462_v45 }
 0x1b7   : > { %v441_v39 = vpop.permute.xlu2 %440 }
 0x1b8   : > { %v452_v43 = vsub.f32 %v1161_v32, %v441_v39 }
 0x1ba   : > { %v456_v46 = vmax.f32 %v452_v43, 0.0 }
 0x1bc   : > { %v460_v48 = vadd.f32 1e-06, %v456_v46  ;;  %v916_v50 = vpop.eup %915 }
 0x1bd   : > { %v485_v54 = vmul.f32 %v916_v50, %v462_v45  ;;  %vm491_vm3 = vweird.f32 %v916_v50 }
 0x1be   : > { %vm1191_vm7 = vmor %vm490_vm5, %vm491_vm3  ;;  %vm470_vm13 = vweird.f32 %v460_v48 }
 0x1bf   : > { %v443_v40 = vpop.permute.xlu0 %442  ;;  %v486_v58 = vmul.f32 %v916_v50, %v485_v54  ;;  %v603_v45 = vpop.permute.xlu2 %602 }
 0x1c0   : > { %v453_v41 = vsub.f32 %v1150_v23, %v443_v40 }
 0x1c1   : > { %v487_v63 = vmul.f32 0.5, %v486_v58 }
 0x1c2   : > { %v457_v44 = vmax.f32 %v453_v41, 0.0 }
 0x1c3   : > { %v488_v4 = vsub.f32 1.5, %v487_v63  ;;  %v630_v63 = vld [vmem:[%s1343_s4] sm:$0xff] }
 0x1c4   : > { %v461_v47 = vadd.f32 1e-06, %v457_v44 }
 0x1c5   : > { %v489_v12 = vmul.f32 %v916_v50, %v488_v4 }
 0x1c6   : > { %917 = vrsqrt.f32 %v461_v47  ;;  %vm480_vm11 = vweird.f32 %v461_v47 }
 0x1c7   : > { %919 = vrsqrt.f32 %v460_v48  ;;  %v493_v17 = vsel %vm1191_vm7, %v916_v50, %v489_v12  ;;  %v601_v39 = vpop.permute.xlu0 %600 }
 0x1c8   : > { %v514_v25 = vsel %vm353_vm0, %v1156_v29, %v493_v17  ;;  %v504_v29 = vld [vmem:[%s1341_s2] sm:$0xff]  ;;  %v632_v17 = vld [vmem:[%s1343_s4 + $0x10] sm:$0xff] }
 0x1cc   : > { %v918_v52 = vpop.eup %917 }
 0x1cd   : > { %v1175_v55 = vpop.eup %919  ;;  %v475_v57 = vmul.f32 %v918_v52, %v461_v47  ;;  %vm481_vm8 = vweird.f32 %v918_v52 }
 0x1ce   : > { %v465_v59 = vmul.f32 %v1175_v55, %v460_v48  ;;  %vm471_vm10 = vweird.f32 %v1175_v55  ;;  %vm1201_vm12 = vmor %vm480_vm11, %vm481_vm8 }
 0x1cf   : > { %v447_v49 = vpop.permute.xlu1 %446  ;;  %v476_v60 = vmul.f32 %v918_v52, %v475_v57  ;;  %vm472_vm14 = vmor %vm470_vm13, %vm471_vm10 }
 0x1d0   : > { %v455_v51 = vsub.f32 %v1163_v34, %v447_v49  ;;  %v466_v0 = vmul.f32 %v1175_v55, %v465_v59  ;;  %v607_v46 = vpop.permute.xlu0 %606 }
 0x1d1   : > { %v477_v2 = vmul.f32 0.5, %v476_v60 }
 0x1d2   : > { %v459_v53 = vmax.f32 %v455_v51, 0.0  ;;  %v467_v5 = vmul.f32 0.5, %v466_v0 }
 0x1d3   : > { %v478_v7 = vsub.f32 1.5, %v477_v2 }
 0x1d4   : > { %v463_v56 = vadd.f32 1e-06, %v459_v53  ;;  %v468_v10 = vsub.f32 1.5, %v467_v5 }
 0x1d5   : > { %v479_v15 = vmul.f32 %v918_v52, %v478_v7  ;;  %v631_v7 = vld [vmem:[%s1343_s4 + $0x8] sm:$0xff] }
 0x1d6   : > { %921 = vrsqrt.f32 %v463_v56  ;;  %vm500_vm6 = vweird.f32 %v463_v56  ;;  %v469_v18 = vmul.f32 %v1175_v55, %v468_v10 }
 0x1d7   : > { %v483_v21 = vsel %vm1201_vm12, %v918_v52, %v479_v15  ;;  %v599_v40 = vpop.permute.xlu1 %598  ;;  %v634_v15 = vld [vmem:[%s1343_s4 + $0x20] sm:$0xff] }
 0x1d8   : > { %v473_v26 = vsel %vm472_vm14, %v1175_v55, %v469_v18  ;;  %v513_v28 = vsel %vm353_vm0, %v1150_v23, %v483_v21  ;;  %v508_v23 = vld [vmem:[%s1341_s2 + $0x20] sm:$0xff]  ;;  %v613_v60 = vpop.permute.xlu0 %612 }
 0x1d9   : > { %v512_v30 = vsel %vm353_vm0, %v1161_v32, %v473_v26  ;;  %v587_v32 = vld [vmem:[%s1342_s3 + $0x28] sm:$0xff] }
 0x1da   : > { %608 = vrot.lane.b32.xlu2 %v587_v32, %s1008_s12 }
 0x1dc   : > { %v922_v1 = vpop.eup %921 }
 0x1dd   : > { %v495_v3 = vmul.f32 %v922_v1, %v463_v56  ;;  %vm501_vm4 = vweird.f32 %v922_v1 }
 0x1de   : > { %vm502_vm9 = vmor %vm500_vm6, %vm501_vm4 }
 0x1df   : > { %v496_v6 = vmul.f32 %v922_v1, %v495_v3  ;;  %v605_v51 = vpop.permute.xlu1 %604  ;;  %v633_v3 = vld [vmem:[%s1343_s4 + $0x18] sm:$0xff] }
 0x1e1   : > { %v497_v8 = vmul.f32 0.5, %v496_v6 }
 0x1e3   : > { %v498_v11 = vsub.f32 1.5, %v497_v8 }
 0x1e5   : > { %v499_v13 = vmul.f32 %v922_v1, %v498_v11 }
 0x1e7   : > { %v503_v16 = vsel %vm502_vm9, %v922_v1, %v499_v13  ;;  %v611_v57 = vpop.permute.xlu1 %610 }
 0x1e8   : > { %v515_v19 = vsel %vm353_vm0, %v1163_v34, %v503_v16  ;;  %v506_v34 = vld [vmem:[%s1341_s2 + $0x10] sm:$0xff] }
 0x1e9   : > { %553 = vmatpush.msrb.mxu0 %v515_v19  ;;  %847 = vmatpush.msra.mxu1 %v515_v19 }
 0x1ea   : > { %848 = vmatpush.msra.mxu2 %v515_v19 }
 0x1eb   : > { %554 = vmatpush.msrb.mxu0 %v514_v25  ;;  %849 = vmatpush.msra.mxu1 %v514_v25 }
 0x1ec   : > { %850 = vmatpush.msra.mxu2 %v514_v25 }
 0x1ed   : > { %555 = vmatpush.msrb.mxu0 %v513_v28  ;;  %851 = vmatpush.msra.mxu1 %v513_v28 }
 0x1ee   : > { %852 = vmatpush.msra.mxu2 %v513_v28  ;;  %v637_v28 = vld [vmem:[%s1343_s4 + $0x38] sm:$0xff] }
 0x1ef   : > { %556 = vmatpush.msrb.mxu0 %v512_v30  ;;  %853 = vmatpush.msra.mxu1 %v512_v30 }
 0x1f0   : > { %854 = vmatpush.msra.mxu2 %v512_v30  ;;  %827 = vmatmul.msk.f32.vlgmr.msrb.gmra.mxu0 %vm516_vm15, %v504_v29 }
 0x1f1   : > { %828 = vmatmul.msk.f32.vlgmr.msra.gmra.mxu1 %vm516_vm15, %v505_v31  ;;  %831 = vmatmul.msk.f32.vlgmr.msra.gmra.mxu2 %vm516_vm15, %v508_v23 }
 0x1f9   : > { %829 = vmatmul.msk.f32.gmra.mxu1 %vm516_vm15, %v506_v34  ;;  %832 = vmatmul.msk.f32.gmra.mxu2 %vm516_vm15, %v509_v35 }
 0x201   : > { %830 = vmatmul.msk.f32.gmra.mxu1 %vm516_vm15, %v507_v36  ;;  %833 = vmatmul.msk.f32.gmra.mxu2 %vm516_vm15, %v510_v37 }
 0x209   : > { %834 = vmatmul.msk.f32.gmra.mxu2 %vm516_vm15, %v511_v38 }
 0x234   : > { %v609_v52 = vpop.permute.xlu2 %608 }
 0x26d   : > { %v558_v41 = vpop.f32.mrf.mxu0 }
 0x26e   : > { %v622_v42 = vmul.f32 %v599_v40, %v558_v41  ;;  %v561_v43 = vpop.f32.mrf.mxu1 }
 0x26f   : > { %v623_v44 = vmul.f32 %v601_v39, %v561_v43 }
 0x270   : > { %646 = vrot.lane.b32.xlu2 %v622_v42, %s1009_s10 }
 0x271   : > { %648 = vrot.lane.b32.xlu1 %v623_v44, %s1009_s10 }
 0x274   : > { %v570_v47 = vpop.f32.mrf.mxu2 }
 0x275   : > { %v626_v48 = vmul.f32 %v607_v46, %v570_v47 }
 0x276   : > { %v564_v49 = vpop.f32.mrf.mxu1 }
 0x277   : > { %v624_v50 = vmul.f32 %v603_v45, %v564_v49 }
 0x279   : > { %654 = vrot.lane.b32.xlu1 %v626_v48, %s1009_s10  ;;  %650 = vrot.lane.b32.xlu0 %v624_v50, %s1009_s10 }
 0x27c   : > { %v573_v53 = vpop.f32.mrf.mxu2 }
 0x27d   : > { %v627_v54 = vmul.f32 %v609_v52, %v573_v53 }
 0x27e   : > { %v567_v55 = vpop.f32.mrf.mxu1 }
 0x27f   : > { %v625_v56 = vmul.f32 %v605_v51, %v567_v55 }
 0x281   : > { %652 = vrot.lane.b32.xlu2 %v625_v56, %s1009_s10  ;;  %656 = vrot.lane.b32.xlu0 %v627_v54, %s1009_s10 }
 0x284   : > { %v576_v58 = vpop.f32.mrf.mxu2 }
 0x285   : > { %v628_v59 = vmul.f32 %v611_v57, %v576_v58 }
 0x289   : > { %658 = vrot.lane.b32.xlu2 %v628_v59, %s1009_s10 }
 0x28c   : > { %v579_v61 = vpop.f32.mrf.mxu2 }
 0x28d   : > { %v629_v62 = vmul.f32 %v613_v60, %v579_v61 }
 0x28f   : > { %660 = vrot.lane.b32.xlu1 %v629_v62, %s1009_s10  ;;  %s838_s10 = sshll.u32 %s1359_s21, 6 }
 0x290   : > { %s263_s14 = scalar_lea.vmem %s1344_s5, %s838_s10 }
 0x2ca   : > { %v647_v0 = vpop.permute.xlu2 %646 }
 0x2cb   : > { %v670_v1 = vmul.f32 %v647_v0, %v558_v41 }
 0x2cd   : > { %v678_v2 = vsub.f32 %v630_v63, %v670_v1 }
 0x2cf   : > { %694 = vrot.lane.b32.xlu0 %v678_v2, %s1008_s12 }
 0x2db   : > { %v653_v4 = vpop.permute.xlu2 %652 }
 0x2dc   : > { %v673_v5 = vmul.f32 %v653_v4, %v567_v55 }
 0x2de   : > { %v681_v6 = vsub.f32 %v633_v3, %v673_v5 }
 0x2e0   : > { %700 = vrot.lane.b32.xlu0 %v681_v6, %s1008_s12 }
 0x2e3   : > { %v649_v8 = vpop.permute.xlu1 %648  ;;  %v659_v10 = vpop.permute.xlu2 %658 }
 0x2e4   : > { %v671_v11 = vmul.f32 %v649_v8, %v561_v43  ;;  %v676_v12 = vmul.f32 %v659_v10, %v576_v58 }
 0x2e6   : > { %v679_v13 = vsub.f32 %v631_v7, %v671_v11  ;;  %v684_v14 = vsub.f32 %v636_v9, %v676_v12 }
 0x2e8   : > { %696 = vrot.lane.b32.xlu2 %v679_v13, %s1008_s12  ;;  %706 = vrot.lane.b32.xlu0 %v684_v14, %s1008_s12 }
 0x2eb   : > { %v655_v16 = vpop.permute.xlu1 %654  ;;  %v651_v18 = vpop.permute.xlu0 %650 }
 0x2ec   : > { %v674_v19 = vmul.f32 %v655_v16, %v570_v47  ;;  %v672_v20 = vmul.f32 %v651_v18, %v564_v49 }
 0x2ee   : > { %v682_v21 = vsub.f32 %v634_v15, %v674_v19  ;;  %v680_v22 = vsub.f32 %v632_v17, %v672_v20 }
 0x2f0   : > { %702 = vrot.lane.b32.xlu2 %v682_v21, %s1008_s12  ;;  %698 = vrot.lane.b32.xlu1 %v680_v22, %s1008_s12 }
 0x2f3   : > { %v657_v25 = vpop.permute.xlu0 %656 }
 0x2f4   : > { %v675_v26 = vmul.f32 %v657_v25, %v573_v53 }
 0x2f6   : > { %v683_v27 = vsub.f32 %v635_v24, %v675_v26 }
 0x2f8   : > { %704 = vrot.lane.b32.xlu1 %v683_v27, %s1008_s12 }
 0x301   : > { %v661_v29 = vpop.permute.xlu1 %660 }
 0x302   : > { %v677_v30 = vmul.f32 %v661_v29, %v579_v61 }
 0x304   : > { %v685_v31 = vsub.f32 %v637_v28, %v677_v30 }
 0x306   : > { %708 = vrot.lane.b32.xlu2 %v685_v31, %s1008_s12 }
 0x341   : > { %v695_v23 = vpop.permute.xlu0 %694 }
 0x342   : > { %v718_v33 = vsel %vm353_vm0, %v647_v0, %v695_v23  ;;  %v697_v32 = vpop.permute.xlu2 %696 }
 0x343   : > { %726 = vst.msk [vmem:[%s263_s14] sm:$0xff] %vm268_vm1, %v718_v33  ;;  %v719_v34 = vsel %vm353_vm0, %v649_v8, %v697_v32 }
 0x344   : > { %727 = vst.msk [vmem:[%s263_s14 + $0x8] sm:$0xff] %vm268_vm1, %v719_v34 }
 0x34a   : > { %v703_v35 = vpop.permute.xlu2 %702 }
 0x34b   : > { %v722_v36 = vsel %vm353_vm0, %v655_v16, %v703_v35 }
 0x34c   : > { %730 = vst.msk [vmem:[%s263_s14 + $0x20] sm:$0xff] %vm268_vm1, %v722_v36 }
 0x352   : > { %v701_v37 = vpop.permute.xlu0 %700 }
 0x353   : > { %v721_v38 = vsel %vm353_vm0, %v653_v4, %v701_v37 }
 0x354   : > { %729 = vst.msk [vmem:[%s263_s14 + $0x18] sm:$0xff] %vm268_vm1, %v721_v38 }
 0x35a   : > { %v707_v39 = vpop.permute.xlu0 %706 }
 0x35b   : > { %v724_v40 = vsel %vm353_vm0, %v659_v10, %v707_v39 }
 0x35c   : > { %732 = vst.msk [vmem:[%s263_s14 + $0x30] sm:$0xff] %vm268_vm1, %v724_v40 }
 0x360   : > { %v709_v41 = vpop.permute.xlu2 %708 }
 0x361   : > { %v725_v42 = vsel %vm353_vm0, %v661_v29, %v709_v41 }
 0x362   : > { %733 = vst.msk [vmem:[%s263_s14 + $0x38] sm:$0xff] %vm268_vm1, %v725_v42  ;;  %v699_v43 = vpop.permute.xlu1 %698 }
 0x363   : > { %v720_v44 = vsel %vm353_vm0, %v651_v18, %v699_v43 }
 0x364   : > { %728 = vst.msk [vmem:[%s263_s14 + $0x10] sm:$0xff] %vm268_vm1, %v720_v44 }
 0x36a   : > { %v705_v45 = vpop.permute.xlu1 %704 }
 0x36b   : > { %v723_v46 = vsel %vm353_vm0, %v657_v25, %v705_v45 }
 0x36c   : > { %731 = vst.msk [vmem:[%s263_s14 + $0x28] sm:$0xff] %vm268_vm1, %v723_v46 }
 0x36d PF: > { %s18_s23 = sadd.s32 1, %s1003_s23   ;;  %s1351_s18 = smov %s987_s19 }
 0x36e   : > { %p15_p0 = scmp.ge.s32.totalorder %s18_s23, 4   ;;  %s1352_s19 = smov %s991_s20 }
 0x36f   : > { %s1353_s20 = smov %s1089_s30  ;;  %s1354_s21 = smov %s999_s22 }
 0x370   : > { %s1355_s22 = smov %s1357_s25  ;;  %17 = sbr.rel (!%p15_p0) target bundleno = 4 (0x4), region = 88 }
 0x375   :  { %755 = vsyncpa [#allocation4], 1 }
 0x376   :  { %757 = vsyncpa [#allocation4 + $0x1], 1 }

</bundles_post_ra>
